<compile_context>
chip_gen: v7x
topology: tpu7x:2x2x1
jax: 0.10.0
libtpu: 0.0.40
codegen_flags: <defaults>
</compile_context>

<pallas_src>
import functools

import jax
import jax.numpy as jnp
from jax.experimental import pallas as pl
from jax.experimental.pallas import tpu as pltpu


_PACK_W = 128  # lane-dense packed-parameter width (one vreg row)


def _channel_attention_kernel(x_ref, p_ref, o_ref, *, batch, cr):
    # x_ref: (B, C, HW) whole tensor; C on sublanes, HW on lanes (lane-dense)
    # p_ref: (C, _PACK_W) packed params:
    #        cols [0,Cr)      = lin1 weight w1 (C, Cr), (in, out) layout
    #        cols [Cr,2Cr)    = lin2 weight transposed w2^T (C, Cr)
    #        col  2Cr         = lin2 bias b2 (C,)
    #        row0 [2Cr+1,3Cr+1) = lin1 bias b1 (Cr,)
    p = p_ref[...]                                      # (C, 128) f32, one DMA
    w1 = p[:, 0:cr]                                     # (C, Cr)
    w2t = p[:, cr:2 * cr]                               # (C, Cr)
    b2 = p[:, 2 * cr:2 * cr + 1]                        # (C, 1)
    b1 = p[0:1, 2 * cr + 1:3 * cr + 1]                  # (1, Cr)

    for b in range(batch):                              # static unroll; batch tiny
        x = x_ref[b].astype(jnp.float32)                # (C, HW)

        # Squeeze: global average over spatial (lane reduction) -> (C, 1)
        avg = jnp.mean(x, axis=1, keepdims=True)

        # Excite FC1 + ReLU: h[j] = sum_c avg[c] * w1[c, j] + b1[j] -> (1, Cr)
        # VPU broadcast-multiply + sublane reduce (no 1-row MXU matmul).
        h = jnp.sum(avg * w1, axis=0, keepdims=True) + b1
        h = jnp.maximum(h, 0.0)

        # Excite FC2 + sigmoid: a[c] = sum_j h[j] * w2t[c, j] + b2[c] -> (C, 1)
        att = jax.nn.sigmoid(jnp.sum(h * w2t, axis=1, keepdims=True) + b2)

        # Scale: broadcast (C, 1) attention across HW lanes; lane-dense store.
        o_ref[b] = (x * att).astype(o_ref.dtype)


def pack_channel_attention_params(w1, b1, w2, b2, pack_width=_PACK_W):
    """Pack lin1/lin2 params into one lane-dense (C, pack_width) f32 buffer.

    w1: (C, Cr), b1: (Cr,), w2: (Cr, C), b2: (C,) — (in, out) layout matching
    `avg @ w1 + b1` / `h @ w2 + b2`. Call once at init; the per-call path then
    issues a single DMA for all FC parameters.
    """
    C, Cr = w1.shape
    assert 3 * Cr + 1 <= pack_width, "packed layout does not fit one vreg row"
    w2t = jnp.reshape(w2, (Cr, C)).T.astype(jnp.float32)          # (C, Cr)
    packed = jnp.zeros((C, pack_width), jnp.float32)
    packed = packed.at[:, 0:Cr].set(jnp.asarray(w1, jnp.float32))
    packed = packed.at[:, Cr:2 * Cr].set(w2t)
    packed = packed.at[:, 2 * Cr].set(jnp.reshape(b2, (C,)).astype(jnp.float32))
    packed = packed.at[0, 2 * Cr + 1:3 * Cr + 1].set(
        jnp.reshape(b1, (Cr,)).astype(jnp.float32))
    return packed, Cr


@functools.partial(jax.jit, static_argnames=("cr",), donate_argnums=(0,))
def channel_attention(x_nchw, packed_params, *, cr):
    """x_nchw: (B, C, H, W); packed_params from pack_channel_attention_params."""
    B, C, H, W = x_nchw.shape
    HW = H * W
    x_bchw = x_nchw.reshape(B, C, HW)                   # metadata-only reshape

    kernel = functools.partial(_channel_attention_kernel, batch=B, cr=cr)
    out = pl.pallas_call(
        kernel,
        out_shape=jax.ShapeDtypeStruct((B, C, HW), x_nchw.dtype),
        grid=(1,),                                       # single step; latency-bound
        in_specs=[
            pl.BlockSpec((B, C, HW), lambda i: (0, 0, 0)),        # x, lane-dense HW
            pl.BlockSpec(packed_params.shape, lambda i: (0, 0)),  # packed FC params
        ],
        out_specs=pl.BlockSpec((B, C, HW), lambda i: (0, 0, 0)),
        # x is fully consumed before each output row is stored -> safe to reuse
        # its HBM buffer; made real by donate_argnums on the jit.
        input_output_aliases={0: 0},
        compiler_params=pltpu.CompilerParams(dimension_semantics=("arbitrary",)),
    )(x_bchw, packed_params)

    return out.reshape(B, C, H, W)                      # metadata-only reshape


def channel_attention_ref(x, w1, b1, w2, b2):
    """Pure-JAX reference mirroring the PyTorch forward."""
    B, C, H, W = x.shape
    xf = x.reshape(B, C, H * W)
    avg = jnp.mean(xf, axis=2)                          # AvgPool1d(H*W) == spatial mean
    h = jnp.maximum(avg @ w1 + b1.reshape(1, -1), 0.0)
    att = jax.nn.sigmoid(h @ w2 + b2.reshape(1, -1))    # (B, C)
    return (xf * att[:, :, None]).reshape(B, C, H, W)


if __name__ == "__main__":
    # Module config: H=W=16, in_channels=8, red_ratio=2 -> out_channels=4
    B, C, H, W = 2, 8, 16, 16
    red_ratio = 2
    Cr = C // red_ratio

    key = jax.random.PRNGKey(0)
    kx, k1, k2, k3, k4 = jax.random.split(key, 5)

    x = jax.random.normal(kx, (B, C, H, W), dtype=jnp.float32)

    # Deterministic Linear params, (in, out) layout, PyTorch-style uniform scale.
    s1 = 1.0 / jnp.sqrt(jnp.float32(C))
    s2 = 1.0 / jnp.sqrt(jnp.float32(Cr))
    w1 = jax.random.uniform(k1, (C, Cr), jnp.float32, -s1, s1)
    b1 = jax.random.uniform(k2, (Cr,), jnp.float32, -s1, s1)
    w2 = jax.random.uniform(k3, (Cr, C), jnp.float32, -s2, s2)
    b2 = jax.random.uniform(k4, (C,), jnp.float32, -s2, s2)

    # One-time parameter packing (hoisted out of the per-call path).
    packed, cr = pack_channel_attention_params(w1, b1, w2, b2)
    packed = jax.block_until_ready(packed)

    # Compute the reference BEFORE the kernel call: x's buffer is donated.
    ref = channel_attention_ref(x, w1, b1, w2, b2)

    out = channel_attention(x, packed, cr=cr)
    out = jax.block_until_ready(out)

    assert out.shape == (B, C, H, W)
    assert jnp.allclose(out, ref, atol=1e-5, rtol=1e-5), "mismatch vs reference"

    print("KERNEL_OK")
</pallas_src>

<mosaic_0001>
module attributes {stable_mosaic.version = 11 : i64} {
  func.func @_channel_attention_kernel(%arg0: i32, %arg1: memref<2x8x256xf32, #tpu.memory_space<vmem>>, %arg2: memref<8x128xf32, #tpu.memory_space<vmem>>, %arg3: memref<2x8x256xf32, #tpu.memory_space<vmem>>) attributes {dimension_semantics = [#tpu.dimension_semantics<arbitrary>], iteration_bounds = array<i64: 1>, scalar_prefetch = 0 : i64, scratch_operands = 0 : i64, tpu.core_type = #tpu.core_type<tc>, window_params = [{pipeline_mode = #tpu.pipeline_mode<synchronous>, transform_indices = @transform_0, window_bounds = array<i64: 2, 8, 256>}, {pipeline_mode = #tpu.pipeline_mode<synchronous>, transform_indices = @transform_1, window_bounds = array<i64: 8, 128>}, {pipeline_mode = #tpu.pipeline_mode<synchronous>, transform_indices = @transform_2, window_bounds = array<i64: 2, 8, 256>}]} {
    %c0 = arith.constant 0 : index
    %c0_0 = arith.constant 0 : index
    %0 = vector.load %arg2[%c0, %c0_0] : memref<8x128xf32, #tpu.memory_space<vmem>>, vector<8x128xf32>
    %1 = vector.extract_strided_slice %0 {offsets = [0, 0], sizes = [8, 4], strides = [1, 1]} : vector<8x128xf32> to vector<8x4xf32>
    %2 = vector.extract_strided_slice %0 {offsets = [0, 4], sizes = [8, 4], strides = [1, 1]} : vector<8x128xf32> to vector<8x4xf32>
    %3 = vector.extract_strided_slice %0 {offsets = [0, 8], sizes = [8, 1], strides = [1, 1]} : vector<8x128xf32> to vector<8x1xf32>
    %4 = vector.extract_strided_slice %0 {offsets = [0, 9], sizes = [1, 4], strides = [1, 1]} : vector<8x128xf32> to vector<1x4xf32>
    %c0_1 = arith.constant 0 : index
    %c0_2 = arith.constant 0 : index
    %c0_3 = arith.constant 0 : index
    %5 = vector.load %arg1[%c0_1, %c0_2, %c0_3] : memref<2x8x256xf32, #tpu.memory_space<vmem>>, vector<1x8x256xf32>
    %6 = vector.shape_cast %5 : vector<1x8x256xf32> to vector<8x256xf32>
    %cst = arith.constant dense<0.000000e+00> : vector<8xf32>
    %7 = vector.multi_reduction <add>, %6, %cst [1] : vector<8x256xf32> to vector<8xf32>
    %8 = vector.shape_cast %7 : vector<8xf32> to vector<8x1xf32>
    %cst_4 = arith.constant 2.560000e+02 : f32
    %9 = vector.broadcast %cst_4 : f32 to vector<8x1xf32>
    %10 = arith.divf %8, %9 : vector<8x1xf32>
    %11 = vector.broadcast %10 : vector<8x1xf32> to vector<8x4xf32>
    %12 = arith.mulf %11, %1 : vector<8x4xf32>
    %cst_5 = arith.constant dense<0.000000e+00> : vector<4xf32>
    %13 = vector.multi_reduction <add>, %12, %cst_5 [0] : vector<8x4xf32> to vector<4xf32>
    %14 = vector.shape_cast %13 : vector<4xf32> to vector<1x4xf32>
    %15 = arith.addf %14, %4 : vector<1x4xf32>
    %cst_6 = arith.constant 0.000000e+00 : f32
    %16 = vector.broadcast %cst_6 : f32 to vector<1x4xf32>
    %17 = arith.maximumf %15, %16 : vector<1x4xf32>
    %18 = vector.broadcast %17 : vector<1x4xf32> to vector<8x4xf32>
    %19 = arith.mulf %18, %2 : vector<8x4xf32>
    %cst_7 = arith.constant dense<0.000000e+00> : vector<8xf32>
    %20 = vector.multi_reduction <add>, %19, %cst_7 [1] : vector<8x4xf32> to vector<8xf32>
    %21 = vector.shape_cast %20 : vector<8xf32> to vector<8x1xf32>
    %22 = arith.addf %21, %3 : vector<8x1xf32>
    %23 = arith.negf %22 : vector<8x1xf32>
    %24 = math.exp %23 : vector<8x1xf32>
    %cst_8 = arith.constant 1.000000e+00 : f32
    %25 = vector.broadcast %cst_8 : f32 to vector<8x1xf32>
    %26 = arith.addf %25, %24 : vector<8x1xf32>
    %27 = arith.divf %25, %26 : vector<8x1xf32>
    %28 = vector.broadcast %27 : vector<8x1xf32> to vector<8x256xf32>
    %29 = arith.mulf %6, %28 : vector<8x256xf32>
    %c0_9 = arith.constant 0 : index
    %c0_10 = arith.constant 0 : index
    %c0_11 = arith.constant 0 : index
    %30 = vector.load %arg3[%c0_9, %c0_10, %c0_11] : memref<2x8x256xf32, #tpu.memory_space<vmem>>, vector<1x8x256xf32>
    %31 = vector.shape_cast %30 : vector<1x8x256xf32> to vector<8x256xf32>
    %32 = vector.shape_cast %29 : vector<8x256xf32> to vector<1x8x256xf32>
    tpu.vector_store %arg3[%c0_9, %c0_10, %c0_11], %32 {strides = array<i32>} : memref<2x8x256xf32, #tpu.memory_space<vmem>>, vector<1x8x256xf32>,
    %c1 = arith.constant 1 : index
    %c0_12 = arith.constant 0 : index
    %c0_13 = arith.constant 0 : index
    %33 = vector.load %arg1[%c1, %c0_12, %c0_13] : memref<2x8x256xf32, #tpu.memory_space<vmem>>, vector<1x8x256xf32>
    %34 = vector.shape_cast %33 : vector<1x8x256xf32> to vector<8x256xf32>
    %cst_14 = arith.constant dense<0.000000e+00> : vector<8xf32>
    %35 = vector.multi_reduction <add>, %34, %cst_14 [1] : vector<8x256xf32> to vector<8xf32>
    %36 = vector.shape_cast %35 : vector<8xf32> to vector<8x1xf32>
    %cst_15 = arith.constant 2.560000e+02 : f32
    %37 = vector.broadcast %cst_15 : f32 to vector<8x1xf32>
    %38 = arith.divf %36, %37 : vector<8x1xf32>
    %39 = vector.broadcast %38 : vector<8x1xf32> to vector<8x4xf32>
    %40 = arith.mulf %39, %1 : vector<8x4xf32>
    %cst_16 = arith.constant dense<0.000000e+00> : vector<4xf32>
    %41 = vector.multi_reduction <add>, %40, %cst_16 [0] : vector<8x4xf32> to vector<4xf32>
    %42 = vector.shape_cast %41 : vector<4xf32> to vector<1x4xf32>
    %43 = arith.addf %42, %4 : vector<1x4xf32>
    %cst_17 = arith.constant 0.000000e+00 : f32
    %44 = vector.broadcast %cst_17 : f32 to vector<1x4xf32>
    %45 = arith.maximumf %43, %44 : vector<1x4xf32>
    %46 = vector.broadcast %45 : vector<1x4xf32> to vector<8x4xf32>
    %47 = arith.mulf %46, %2 : vector<8x4xf32>
    %cst_18 = arith.constant dense<0.000000e+00> : vector<8xf32>
    %48 = vector.multi_reduction <add>, %47, %cst_18 [1] : vector<8x4xf32> to vector<8xf32>
    %49 = vector.shape_cast %48 : vector<8xf32> to vector<8x1xf32>
    %50 = arith.addf %49, %3 : vector<8x1xf32>
    %51 = arith.negf %50 : vector<8x1xf32>
    %52 = math.exp %51 : vector<8x1xf32>
    %cst_19 = arith.constant 1.000000e+00 : f32
    %53 = vector.broadcast %cst_19 : f32 to vector<8x1xf32>
    %54 = arith.addf %53, %52 : vector<8x1xf32>
    %55 = arith.divf %53, %54 : vector<8x1xf32>
    %56 = vector.broadcast %55 : vector<8x1xf32> to vector<8x256xf32>
    %57 = arith.mulf %34, %56 : vector<8x256xf32>
    %c1_20 = arith.constant 1 : index
    %c0_21 = arith.constant 0 : index
    %c0_22 = arith.constant 0 : index
    %58 = vector.load %arg3[%c1_20, %c0_21, %c0_22] : memref<2x8x256xf32, #tpu.memory_space<vmem>>, vector<1x8x256xf32>
    %59 = vector.shape_cast %58 : vector<1x8x256xf32> to vector<8x256xf32>
    %60 = vector.shape_cast %57 : vector<8x256xf32> to vector<1x8x256xf32>
    tpu.vector_store %arg3[%c1_20, %c0_21, %c0_22], %60 {strides = array<i32>} : memref<2x8x256xf32, #tpu.memory_space<vmem>>, vector<1x8x256xf32>,
    return
  }
  func.func @transform_0(%arg0: i32) -> (i32, i32, i32) {
    %c0_i32 = arith.constant 0 : i32
    %c0_i32_0 = arith.constant 0 : i32
    %c0_i32_1 = arith.constant 0 : i32
    %c0_i32_2 = arith.constant 0 : i32
    return %c0_i32, %c0_i32_0, %c0_i32_1 : i32, i32, i32
  }
  func.func @transform_1(%arg0: i32) -> (i32, i32) {
    %c0_i32 = arith.constant 0 : i32
    %c0_i32_0 = arith.constant 0 : i32
    %c0_i32_1 = arith.constant 0 : i32
    return %c0_i32, %c0_i32_0 : i32, i32
  }
  func.func @transform_2(%arg0: i32) -> (i32, i32, i32) {
    %c0_i32 = arith.constant 0 : i32
    %c0_i32_0 = arith.constant 0 : i32
    %c0_i32_1 = arith.constant 0 : i32
    %c0_i32_2 = arith.constant 0 : i32
    return %c0_i32, %c0_i32_0, %c0_i32_1 : i32, i32, i32
  }
}

</mosaic_0001>

<bundles_post_ra>
// kernel: channel_attention.1
= control target key start
LH: loop header
LB: loop body
LE: loop exit
PB: predicated region body
PF: predicated region fallthrough
CT: control target
= control target key end

     0   :  { %s126_s19 = smov 119   ;;  %s127_s20 = smov 124   ;;  %vm20_vm0 = vcmask 31744   ;;  %v34_v19 = vlaneseq  ;;  %v128_v42 = vmov 8   ;;  %s191_s0 = inlined_call_operand.vmem [shape: f32[2,8,256], index: 0, kind: input, shape index: {}, may-alias: {0,2}]   ;;  %s192_s1 = inlined_call_operand.vmem [shape: f32[8,128], index: 1, kind: input, shape index: {}]   ;;  %s193_s2 = inlined_call_operand.vmem [shape: f32[2,8,256], index: 2, kind: output, shape index: {}, may-alias: {0,2}]  }
   0x1   :  { %v147_v0 = vld [vmem:[%s191_s0] sm:$0xff]  ;;  %v152_v1 = vld [vmem:[%s191_s0 + $0x8] sm:$0xff]  ;;  %v157_v2 = vld [vmem:[%s191_s0 + $0x10] sm:$0xff]  ;;  %116 = vset.pattern.permute.xlu0 %v128_v42  ;;  %117 = vset.pattern.permute.xlu1 %v128_v42 }
   0x2   :  { %v14_v3 = vadd.f32 %v152_v1, %v147_v0  ;;  %v164_v4 = vld [vmem:[%s191_s0 + $0x18] sm:$0xff]  ;;  %v11_v5 = vld [vmem:[%s192_s1] sm:$0xff]  ;;  %v35_v24 = vshrl.u32 %v34_v19, 7 }
   0x3   :  { %29 = vrot.lane.b32.xlu1 %v11_v5, %s126_s19  ;;  %v64_v6 = vadd.f32 %v164_v4, %v157_v2 }
   0x4   :  { %15 = vadd.xlane.f32.xlu0 %v14_v3  ;;  %v36_v30 = vsub.s32 0, %v35_v24 }
   0x7   :  { %38 = vrot.lane.b32.xlu1 %v11_v5, %s127_s20 }
   0x8   :  { %65 = vadd.xlane.f32.xlu0 %v64_v6 }
  0x75   :  { %v30_v25 = vpop.permute.xlu1 %29 }
  0x79   :  { %v39_v33 = vpop.permute.xlu1 %38 }
  0x91   :  { %v16_v7 = vpop.xlane.xlu0 %15 }
  0x92   :  { %v18_v8 = vmul.f32 0.00390625, %v16_v7 }
  0x94   :  { %v19_v9 = vmul.f32 %v18_v8, %v11_v5 }
  0x95   :  { %v66_v10 = vpop.xlane.xlu0 %65 }
  0x96   :  { %v21_v11 = vsel %vm20_vm0, %v19_v9, 0.0  ;;  %v67_v12 = vmul.f32 0.00390625, %v66_v10 }
  0x97   :  { %v22_v13 = vrot.slane %v21_v11, 4 }
  0x98   :  { %v68_v14 = vmul.f32 %v67_v12, %v11_v5 }
  0x99   :  { %v23_v15 = vadd.f32 %v22_v13, %v21_v11 }
  0x9a   :  { %v69_v16 = vsel %vm20_vm0, %v68_v14, 0.0 }
  0x9b   :  { %v24_v17 = vrot.slane %v23_v15, 2  ;;  %v70_v18 = vrot.slane %v69_v16, 4 }
  0x9d   :  { %v71_v20 = vadd.f32 %v70_v18, %v69_v16  ;;  %v25_v21 = vadd.f32 %v24_v17, %v23_v15 }
  0x9f   :  { %v72_v22 = vrot.slane %v71_v20, 2  ;;  %v26_v23 = vrot.slane %v25_v21, 1 }
  0xa1   :  { %v27_v26 = vadd.f32 %v26_v23, %v25_v21  ;;  %v73_v27 = vadd.f32 %v72_v22, %v71_v20 }
  0xa3   :  { %v32_v28 = vadd.f32 %v30_v25, %v27_v26  ;;  %v74_v29 = vrot.slane %v73_v27, 1 }
  0xa5   :  { %v33_v31 = vmax.f32 %v32_v28, 0.0  ;;  %v75_v32 = vadd.f32 %v74_v29, %v73_v27 }
  0xa7   :  { %v76_v34 = vadd.f32 %v75_v32, %v30_v25  ;;  %v37_v35 = vrot.slane %v33_v31, %v36_v30 }
  0xa9   :  { %v77_v36 = vmax.f32 %v76_v34, 0.0  ;;  %v41_v37 = vmul.f32 %v39_v33, %v37_v35 }
  0xab   :  { %v81_v38 = vrot.slane %v77_v36, %v36_v30  ;;  %v42_v39 = vsel %vm20_vm0, %v41_v37, 0.0 }
  0xac   :  { %43 = vadd.xlane.f32.xlu0 %v42_v39 }
  0xad   :  { %v82_v40 = vmul.f32 %v81_v38, %v39_v33 }
  0xaf   :  { %v83_v41 = vsel %vm20_vm0, %v82_v40, 0.0 }
  0xb0   :  { %84 = vadd.xlane.f32.xlu1 %v83_v41 }
 0x139   :  { %v44_v43 = vpop.xlane.xlu0 %43 }
 0x13a   :  { %v45_v44 = vadd.f32 %v44_v43, %v11_v5 }
 0x13c   :  { %v107_v45 = vmul.f32 -1.442695, %v45_v44 }
 0x13d   :  { %v85_v46 = vpop.xlane.xlu1 %84 }
 0x13e   :  { %118 = vpow2.f32 %v107_v45  ;;  %v86_v47 = vadd.f32 %v85_v46, %v11_v5 }
 0x140   :  { %v110_v48 = vmul.f32 -1.442695, %v86_v47 }
 0x142   :  { %120 = vpow2.f32 %v110_v48 }
 0x148   :  { %v119_v49 = vpop.eup %118 }
 0x149   :  { %v49_v50 = vadd.f32 1.0, %v119_v49 }
 0x14b   :  { %122 = vrcp.f32 %v49_v50 }
 0x14c   :  { %v121_v51 = vpop.eup %120 }
 0x14d   :  { %v90_v52 = vadd.f32 1.0, %v121_v51 }
 0x14f   :  { %124 = vrcp.f32 %v90_v52 }
 0x155   :  { %v123_v53 = vpop.eup %122 }
 0x156   :  { %54 = vperm.xlu0 %116, %v123_v53  }
 0x159   :  { %v125_v54 = vpop.eup %124 }
 0x15a   :  { %95 = vperm.xlu1 %117, %v125_v54  }
 0x1d5   :  { %v55_v55 = vpop.permute.xlu0 %54 }
 0x1d6   :  { %v57_v56 = vmul.f32 %v55_v55, %v147_v0  ;;  %v58_v57 = vmul.f32 %v55_v55, %v152_v1 }
 0x1d8   :  { %59 = vst [vmem:[%s193_s2] sm:$0xff] %v57_v56  ;;  %60 = vst [vmem:[%s193_s2 + $0x8] sm:$0xff] %v58_v57 }
 0x1d9   :  { %v96_v58 = vpop.permute.xlu1 %95 }
 0x1da   :  { %v98_v59 = vmul.f32 %v157_v2, %v96_v58  ;;  %v99_v60 = vmul.f32 %v164_v4, %v96_v58 }
 0x1dc   :  { %111 = vst [vmem:[%s193_s2 + $0x10] sm:$0xff] %v98_v59  ;;  %112 = vst [vmem:[%s193_s2 + $0x18] sm:$0xff] %v99_v60 }

</bundles_post_ra>
